<compile_context>
chip_gen: v6e
topology: v6e:2x2x1
jax: 0.10.0
libtpu: 0.0.40
codegen_flags: <defaults>
</compile_context>

<pallas_src>
import math

import jax
import jax.numpy as jnp
from jax.experimental import pallas as pl
from jax.experimental.pallas import tpu as pltpu


# ----------------------------- Pallas kernel ------------------------------ #
def _rope_kernel(pos_ref, freq_ref, x_ref, o_ref):
    # x: (tile_n, d_k) with interleaved (re, im) pairs along the last dim.
    x = x_ref[...].astype(jnp.float32)

    # Angles: pos (tile_n, 1) * signed inv_freq (1, d_k) -> (tile_n, d_k).
    # freq_ref already carries the sign pattern [-f_j, +f_j, -f_{j+1}, ...],
    # so cos(ang) is the interleaved cos table and sin(ang) is the
    # sign-corrected interleaved sin table.
    ang = pos_ref[...] * freq_ref[...]
    c = jnp.cos(ang)
    s = jnp.sin(ang)

    # Partner element of each pair: partner[2j] = x[2j+1], partner[2j+1] = x[2j].
    d = x.shape[-1]
    nxt = pltpu.roll(x, shift=d - 1, axis=1)   # nxt[k] = x[(k+1) % d]
    prv = pltpu.roll(x, shift=1, axis=1)       # prv[k] = x[(k-1) % d]
    lane = jax.lax.broadcasted_iota(jnp.int32, x.shape, dimension=1)
    partner = jnp.where((lane & 1) == 0, nxt, prv)

    # out[2j]   = x[2j]*cos   + x[2j+1]*(-sin)
    # out[2j+1] = x[2j+1]*cos + x[2j]  *(+sin)
    o_ref[...] = (x * c + partner * s).astype(o_ref.dtype)


def _rope_pallas(x, pos, freq, *, max_tile_n=512):
    """x: (N, d_k); pos: (N, 1) f32; freq: (1, d_k) f32 (sign-folded)."""
    N, D = x.shape
    # Full-array block if it fits, else large multiple-of-8 row tiles.
    tile_n = N if N <= max_tile_n else max_tile_n
    grid = (pl.cdiv(N, tile_n),)

    itemsize = jnp.dtype(x.dtype).itemsize
    cost = pl.CostEstimate(
        flops=3 * N * D,                       # 2 mul + 1 add per output elem
        transcendentals=2 * N * D,             # cos + sin per element
        bytes_accessed=2 * N * D * itemsize + N * 4 + D * 4,
    )

    return pl.pallas_call(
        _rope_kernel,
        out_shape=jax.ShapeDtypeStruct((N, D), x.dtype),
        grid_spec=pltpu.PrefetchScalarGridSpec(
            num_scalar_prefetch=0,
            grid=grid,
            in_specs=[
                pl.BlockSpec((tile_n, 1), lambda i: (i, 0)),   # token positions
                pl.BlockSpec((1, D), lambda i: (0, 0)),        # signed inv freqs
                pl.BlockSpec((tile_n, D), lambda i: (i, 0)),   # x
            ],
            out_specs=pl.BlockSpec((tile_n, D), lambda i: (i, 0)),
        ),
        compiler_params=pltpu.CompilerParams(
            dimension_semantics=("parallel",)),
        cost_estimate=cost,
    )(pos, freq, x)


# --------------------------- Module equivalent ----------------------------- #
class RotaryEmbedding:
    def __init__(self, theta: float, d_k: int, max_seq_len: int):
        assert d_k % 2 == 0
        self.d_k = d_k
        self.max_seq_len = max_seq_len
        half = d_k // 2

        inv_freq = 1.0 / (
            theta ** (jnp.arange(0, d_k, 2, dtype=jnp.float32)[:half] / d_k)
        )                                                     # (half,)
        # Interleave to full width and fold the sin sign into the angle:
        #   freq_signed[2j] = -inv_freq_j, freq_signed[2j+1] = +inv_freq_j
        # so cos(pos*freq_signed) = cos(pos*f_j) (even & odd) and
        #    sin(pos*freq_signed) = -/+ sin(pos*f_j) as needed.
        sign = jnp.array([-1.0, 1.0], dtype=jnp.float32)
        self.freq_signed = (inv_freq[:, None] * sign[None, :]).reshape(1, d_k)

        # Plain cos/sin tables kept only for the pure-JAX reference check.
        # (torch.angle(polar(1, f)) wraps f to (-pi, pi]; cos/sin are unchanged.)
        t = jnp.arange(max_seq_len, dtype=jnp.float32)
        ang = jnp.outer(t, inv_freq)
        self.cos_table = jnp.cos(ang)
        self.sin_table = jnp.sin(ang)

    def __call__(self, x: jnp.ndarray, token_positions: jnp.ndarray) -> jnp.ndarray:
        """x: (..., seq_len, d_k); token_positions: broadcastable to (..., seq_len)."""
        *lead, S, D = x.shape
        assert D == self.d_k

        # Bounds check only in eager mode (no host sync / trace break under jit).
        if not isinstance(token_positions, jax.core.Tracer):
            max_pos = int(jnp.max(token_positions))
            if max_pos >= self.max_seq_len:
                raise ValueError(
                    f"Token position {max_pos} exceeds maximum sequence length "
                    f"{self.max_seq_len - 1}")

        N = math.prod(lead) * S
        x_flat = x.reshape(N, D)                                   # free reshape
        pos = jnp.broadcast_to(token_positions, (*lead, S))
        pos_f = pos.reshape(N, 1).astype(jnp.float32)

        out_flat = _rope_pallas(x_flat, pos_f, self.freq_signed)
        return out_flat.reshape(*lead, S, D)


# -------------------------------- Reference -------------------------------- #
def _rope_reference(x, token_positions, cos_table, sin_table):
    cos = cos_table[token_positions].astype(jnp.float32)  # (..., S, half)
    sin = sin_table[token_positions].astype(jnp.float32)
    x_re = x[..., ::2].astype(jnp.float32)
    x_im = x[..., 1::2].astype(jnp.float32)
    out = jnp.zeros(x.shape, jnp.float32)
    out = out.at[..., ::2].set(x_re * cos - x_im * sin)
    out = out.at[..., 1::2].set(x_re * sin + x_im * cos)
    return out.astype(x.dtype)


if __name__ == "__main__":
    theta = 10000.0
    d_k = 32
    max_seq_len = 16
    batch = 2
    seq = 8

    rope = RotaryEmbedding(theta=theta, d_k=d_k, max_seq_len=max_seq_len)

    key = jax.random.PRNGKey(0)
    x = jax.random.normal(key, (batch, seq, d_k), dtype=jnp.float32)
    token_positions = jnp.broadcast_to(
        jnp.arange(seq, dtype=jnp.int32), (batch, seq))

    out = jax.block_until_ready(rope(x, token_positions))

    ref = _rope_reference(x, token_positions, rope.cos_table, rope.sin_table)
    assert out.shape == x.shape and out.dtype == x.dtype
    assert jnp.allclose(out, ref, atol=1e-4, rtol=1e-4), "mismatch vs reference"

    print("KERNEL_OK")
</pallas_src>

<mosaic_0001>
module attributes {stable_mosaic.version = 11 : i64} {
  func.func @_rope_kernel(%arg0: i32, %arg1: memref<16x1xf32, #tpu.memory_space<vmem>>, %arg2: memref<1x32xf32, #tpu.memory_space<vmem>>, %arg3: memref<16x32xf32, #tpu.memory_space<vmem>>, %arg4: memref<16x32xf32, #tpu.memory_space<vmem>>) attributes {dimension_semantics = [#tpu.dimension_semantics<parallel>], iteration_bounds = array<i64: 1>, scalar_prefetch = 0 : i64, scratch_operands = 0 : i64, tpu.core_type = #tpu.core_type<tc>, window_params = [{transform_indices = @transform_0, window_bounds = array<i64: 16, 1>}, {pipeline_mode = #tpu.pipeline_mode<synchronous>, transform_indices = @transform_1, window_bounds = array<i64: 1, 32>}, {transform_indices = @transform_2, window_bounds = array<i64: 16, 32>}, {transform_indices = @transform_3, window_bounds = array<i64: 16, 32>}]} {
    %c0 = arith.constant 0 : index
    %c0_0 = arith.constant 0 : index
    %0 = vector.load %arg3[%c0, %c0_0] : memref<16x32xf32, #tpu.memory_space<vmem>>, vector<16x32xf32>
    %c0_1 = arith.constant 0 : index
    %c0_2 = arith.constant 0 : index
    %1 = vector.load %arg1[%c0_1, %c0_2] : memref<16x1xf32, #tpu.memory_space<vmem>>, vector<16x1xf32>
    %c0_3 = arith.constant 0 : index
    %c0_4 = arith.constant 0 : index
    %2 = vector.load %arg2[%c0_3, %c0_4] : memref<1x32xf32, #tpu.memory_space<vmem>>, vector<1x32xf32>
    %3 = vector.broadcast %1 : vector<16x1xf32> to vector<16x32xf32>
    %4 = vector.broadcast %2 : vector<1x32xf32> to vector<16x32xf32>
    %5 = arith.mulf %3, %4 : vector<16x32xf32>
    %6 = math.cos %5 : vector<16x32xf32>
    %7 = math.sin %5 : vector<16x32xf32>
    %c31_i32 = arith.constant 31 : i32
    %8 = tpu.dynamic_rotate %0 by %c31_i32 dim 1 : vector<16x32xf32>, i32 -> vector<16x32xf32>
    %c1_i32 = arith.constant 1 : i32
    %9 = tpu.dynamic_rotate %0 by %c1_i32 dim 1 : vector<16x32xf32>, i32 -> vector<16x32xf32>
    %10 = tpu.iota {dimensions = array<i32: 1>} : vector<16x32xi32>
    %c1_i32_5 = arith.constant 1 : i32
    %11 = vector.broadcast %c1_i32_5 : i32 to vector<16x32xi32>
    %12 = arith.andi %10, %11 : vector<16x32xi32>
    %c0_i32 = arith.constant 0 : i32
    %13 = vector.broadcast %c0_i32 : i32 to vector<16x32xi32>
    %14 = arith.cmpi eq, %12, %13 : vector<16x32xi32>
    %15 = arith.select %14, %8, %9 : vector<16x32xi1>, vector<16x32xf32>
    %16 = arith.mulf %0, %6 : vector<16x32xf32>
    %17 = arith.mulf %15, %7 : vector<16x32xf32>
    %18 = arith.addf %16, %17 : vector<16x32xf32>
    %c0_6 = arith.constant 0 : index
    %c0_7 = arith.constant 0 : index
    %19 = vector.load %arg4[%c0_6, %c0_7] : memref<16x32xf32, #tpu.memory_space<vmem>>, vector<16x32xf32>
    tpu.vector_store %arg4[%c0_6, %c0_7], %18 {strides = array<i32>} : memref<16x32xf32, #tpu.memory_space<vmem>>, vector<16x32xf32>,
    return
  }
  func.func @transform_0(%arg0: i32) -> (i32, i32) {
    %c0_i32 = arith.constant 0 : i32
    %c0_i32_0 = arith.constant 0 : i32
    return %arg0, %c0_i32 : i32, i32
  }
  func.func @transform_1(%arg0: i32) -> (i32, i32) {
    %c0_i32 = arith.constant 0 : i32
    %c0_i32_0 = arith.constant 0 : i32
    %c0_i32_1 = arith.constant 0 : i32
    return %c0_i32, %c0_i32_0 : i32, i32
  }
  func.func @transform_2(%arg0: i32) -> (i32, i32) {
    %c0_i32 = arith.constant 0 : i32
    %c0_i32_0 = arith.constant 0 : i32
    return %arg0, %c0_i32 : i32, i32
  }
  func.func @transform_3(%arg0: i32) -> (i32, i32) {
    %c0_i32 = arith.constant 0 : i32
    %c0_i32_0 = arith.constant 0 : i32
    return %arg0, %c0_i32 : i32, i32
  }
}

</mosaic_0001>

<bundles_post_ra>
// kernel: tpu_custom_call.1
= control target key start
LH: loop header
LB: loop body
LE: loop exit
PB: predicated region body
PF: predicated region fallthrough
CT: control target
= control target key end

     0   :  { %s580_s16 = smov 32   ;;  %v581_v2 = vmov 0   ;;  %s782_s0 = inlined_call_operand.vmem [shape: f32[16,1], index: 0, kind: input, shape index: {}]   ;;  %s783_s1 = inlined_call_operand.vmem [shape: f32[1,32], index: 1, kind: input, shape index: {}]   ;;  %s784_s2 = inlined_call_operand.vmem [shape: f32[16,32], index: 2, kind: input, shape index: {}]   ;;  %s785_s3 = inlined_call_operand.hbm [shape: f32[16,32], index: 3, kind: output, shape index: {}]  }
   0x1   :  { %v616_v0 = vld [vmem:[%s784_s2] sm:$0xff]  ;;  %548 = vset.pattern.permute.xlu1 %v581_v2  ;;  %v625_v3 = vld [vmem:[%s784_s2 + $0x8] sm:$0xff]  ;;  %549 = vset.pattern.permute.xlu0 %v581_v2 }
   0x2   :  { %v17_v1 = vld [vmem:[%s782_s0] sm:$0xff]  ;;  %453 = vrot.lane.b32.xlu0 %v616_v0, %s580_s16  ;;  %v18_v4 = vld [vmem:[%s782_s0 + $0x8] sm:$0xff] }
   0x3   :  { %22 = vperm.xlu1 %548, %v17_v1  }
   0x4   :  { %8 = vsyncpa [#allocation3], 0  ;;  %vm452_vm0 = vcmask 1047808   ;;  %v510_v10 = vld [vmem:[%s783_s1] ss:$0 sm:$0xff]  ;;  %s588_s0 = smov 127  }
   0x5   :  { %v582_v29 = vmov 683565275   ;;  %v583_v32 = vmov 2475754826   ;;  %v584_v34 = vmov 2102212464  }
   0x6   :  { %456 = vrot.lane.b32.xlu0 %v625_v3, %s580_s16  ;;  %v585_v36 = vmov 920167782   ;;  %v586_v40 = vmov 1326507024   ;;  %v587_v43 = vmov 2131351028  }
   0x7   :  { %27 = vperm.xlu1 %548, %v18_v4   ;;  %s589_s1 = smov 97   ;;  %s590_s22 = smov [#allocation2]  }
   0x8   :  { %s499_s23 = sshll.u32 %s590_s22, 4  ;;  %s500_s23 = int_to_ptr.vmem [resolvable:$true] %s499_s23 }
   0x9   :  { %s558_s24 = scalar_lea.vmem %s500_s23, 256  ;;  %p563_p1 = scmp.lt.s32.totalorder %s500_s23, %s500_s23 }
   0xa   :  { %p559_p0 = scmp.ne.s32.totalorder %s500_s23, %s558_s24  ;;  %p564_p2 = scmp.lt.s32.totalorder %s558_s24, %s558_s24 }
   0xc   :  { %p565_p3 = por %p564_p2, %p563_p1 }
   0xe   :  { %p566_p4 = pnand %p565_p3, %p559_p0 }
  0x74   :  { %v454_v5 = vpop.permute.xlu0 %453 }
  0x75   :  { %v455_v6 = vsel %vm452_vm0, %v454_v5, %v616_v0 }
  0x76   :  { %459 = vrot.lane.b32.xlu0 %v455_v6, %s580_s16 }
  0x78   :  { %v457_v7 = vpop.permute.xlu0 %456 }
  0x79   :  { %v458_v8 = vsel %vm452_vm0, %v457_v7, %v625_v3 }
  0x7a   :  { %461 = vrot.lane.b32.xlu1 %v458_v8, %s580_s16 }
  0x7e   :  { %v23_v9 = vpop.permute.xlu1 %22 }
  0x7f   :  { %v638_v11 = vmul.f32 %v510_v10, %v23_v9 }
  0x81   :  { %v41_v13 = vand.u32 2139095040, %v638_v11  ;;  %v38_v27 = vand.u32 2147483647, %v638_v11  ;;  %vm40_vm15 = vcmp.lt.s32.totalorder %v638_v11, 0 }
  0x82   :  { %v28_v12 = vpop.permute.xlu1 %27 }
  0x83   :  { %v641_v14 = vmul.f32 %v510_v10, %v28_v12  ;;  %v42_v15 = vshrl.u32 %v41_v13, 23  ;;  %v45_v47 = vand.u32 8388607, %v38_v27 }
  0x85   :  { %v144_v16 = vand.u32 2139095040, %v641_v14  ;;  %v511_v17 = vadd.s32 4294967169, %v42_v15  ;;  %v141_v31 = vand.u32 2147483647, %v641_v14  ;;  %v46_v5 = vor.u32 8388608, %v45_v47 }
  0x87   :  { %v145_v18 = vshrl.u32 %v144_v16, 23  ;;  %v48_v19 = vadd.s32 1, %v511_v17  ;;  %v148_v48 = vand.u32 8388607, %v141_v31 }
  0x89   :  { %v515_v20 = vadd.s32 4294967169, %v145_v18  ;;  %vm49_vm1 = vcmp.gt.s32.totalorder %v48_v19, 0  ;;  %v149_v10 = vor.u32 8388608, %v148_v48 }
  0x8a   :  { %v50_v22 = vsel %vm49_vm1, %v48_v19, 0  ;;  %v86_v19 = vshll.u32 %v46_v5, 8  ;;  %vm143_vm1 = vcmp.lt.s32.totalorder %v641_v14, 0 }
  0x8b   :  { %v151_v21 = vadd.s32 1, %v515_v20  ;;  %v52_v23 = vand.u32 31, %v50_v22  ;;  %v647_v28 = vshrl.u32 %v50_v22, 5 }
  0x8d   :  { %vm152_vm2 = vcmp.gt.s32.totalorder %v151_v21, 0  ;;  %v644_v25 = vsub.s32 32, %v52_v23  ;;  %v55_v30 = vshll.u32 %v582_v29, %v52_v23  ;;  %v64_v35 = vshll.u32 %v584_v34, %v52_v23 }
  0x8e   :  { %v153_v24 = vsel %vm152_vm2, %v151_v21, 0  ;;  %v67_v39 = vshll.u32 %v585_v36, %v52_v23  ;;  %v58_v42 = vshll.u32 %v583_v32, %v52_v23  ;;  %v61_v45 = vshll.u32 %v587_v43, %v52_v23 }
  0x8f   :  { %v155_v26 = vand.u32 31, %v153_v24  ;;  %v56_v33 = vshrl.u32 %v583_v32, %v644_v25  ;;  %v65_v37 = vshrl.u32 %v585_v36, %v644_v25  ;;  %v68_v41 = vshrl.u32 %v586_v40, %v644_v25 }
  0x90   :  { %v59_v44 = vshrl.u32 %v587_v43, %v644_v25  ;;  %v62_v46 = vshrl.u32 %v584_v34, %v644_v25  ;;  %vm70_vm3 = vcmp.lt.s32.totalorder %v647_v28, 1  ;;  %vm73_vm4 = vcmp.lt.s32.totalorder %v647_v28, 4 }
  0x91   :  { %v653_v38 = vsub.s32 32, %v155_v26  ;;  %v57_v49 = vor.u32 %v56_v33, %v55_v30  ;;  %v66_v50 = vor.u32 %v65_v37, %v64_v35  ;;  %v167_v51 = vshll.u32 %v584_v34, %v155_v26 }
  0x92   :  { %v69_v53 = vor.u32 %v68_v41, %v67_v39  ;;  %v665_v54 = vshrl.u32 %v153_v24, 5  ;;  %v170_v55 = vshll.u32 %v585_v36, %v155_v26  ;;  %v60_v57 = vor.u32 %v59_v44, %v58_v42 }
  0x93   :  { %v168_v52 = vshrl.u32 %v585_v36, %v653_v38  ;;  %v171_v56 = vshrl.u32 %v586_v40, %v653_v38  ;;  %v63_v58 = vor.u32 %v62_v46, %v61_v45  ;;  %v158_v59 = vshll.u32 %v582_v29, %v155_v26 }
  0x94   :  { %v161_v60 = vshll.u32 %v583_v32, %v155_v26  ;;  %v159_v61 = vshrl.u32 %v583_v32, %v653_v38  ;;  %v162_v62 = vshrl.u32 %v587_v43, %v653_v38  ;;  %v164_v63 = vshll.u32 %v587_v43, %v155_v26 }
  0x95   :  { %v165_v1 = vshrl.u32 %v584_v34, %v653_v38  ;;  %vm72_vm5 = vcmp.lt.s32.totalorder %v647_v28, 3  ;;  %v79_v2 = vsel %vm73_vm4, %v66_v50, 920167782  ;;  %v169_v4 = vor.u32 %v168_v52, %v167_v51 }
  0x96   :  { %v83_v6 = vsel %vm73_vm4, %v69_v53, 1326507024  ;;  %v172_v7 = vor.u32 %v171_v56, %v170_v55  ;;  %vm176_vm6 = vcmp.lt.s32.totalorder %v665_v54, 4  ;;  %vm71_vm7 = vcmp.lt.s32.totalorder %v647_v28, 2 }
  0x97   :  { %v78_v8 = vsel %vm70_vm3, %v57_v49, %v60_v57  ;;  %v82_v9 = vsel %vm70_vm3, %v60_v57, %v63_v58  ;;  %v80_v12 = vsel %vm72_vm5, %v63_v58, %v79_v2  ;;  %v160_v13 = vor.u32 %v159_v61, %v158_v59 }
  0x98   :  { %v163_v15 = vor.u32 %v162_v62, %v161_v60  ;;  %v166_v16 = vor.u32 %v165_v1, %v164_v63  ;;  %v84_v17 = vsel %vm72_vm5, %v66_v50, %v83_v6  ;;  %vm173_vm8 = vcmp.lt.s32.totalorder %v665_v54, 1 }
  0x99   :  { %vm175_vm9 = vcmp.lt.s32.totalorder %v665_v54, 3  ;;  %v182_v18 = vsel %vm176_vm6, %v169_v4, 920167782  ;;  %v186_v20 = vsel %vm176_vm6, %v172_v7, 1326507024  ;;  %v81_v21 = vsel %vm71_vm7, %v78_v8, %v80_v12 }
  0x9a   :  { %v85_v22 = vsel %vm71_vm7, %v82_v9, %v84_v17  ;;  %vm174_vm10 = vcmp.lt.s32.totalorder %v665_v54, 2  ;;  %v181_v23 = vsel %vm173_vm8, %v160_v13, %v163_v15  ;;  %v183_v24 = vsel %vm175_vm9, %v166_v16, %v182_v18 }
  0x9b   :  { %v185_v26 = vsel %vm173_vm8, %v163_v15, %v166_v16  ;;  %v187_v30 = vsel %vm175_vm9, %v169_v4, %v186_v20  ;;  %v189_v32 = vshll.u32 %v149_v10, 8  ;;  %v54_v34 = vshrl.u32 %v582_v29, %v644_v25 }
  0x9c   :  { %v708_v35 = vmul.u32.u64.low %v86_v19, %v81_v21  ;;  %v709_v36 = vmul.u32.u64.high %v86_v19, %v81_v21, %v708_v35  ;;  %v713_v39 = vmul.u32.u64.low %v86_v19, %v85_v22  ;;  %v714_v40 = vmul.u32.u64.high %v86_v19, %v85_v22, %v713_v39 }
  0x9d   :  { %v184_v41 = vsel %vm174_vm10, %v181_v23, %v183_v24  ;;  %v75_v42 = vsel %vm73_vm4, %v63_v58, 2102212464  ;;  %v188_v25 = vsel %vm174_vm10, %v185_v26, %v187_v30  ;;  %v74_v44 = vsel %vm70_vm3, %v54_v34, %v57_v49 }
  0x9e   :  { %v724_v45 = vmul.u32.u64.low %v189_v32, %v184_v41  ;;  %v725_v46 = vmul.u32.u64.high %v189_v32, %v184_v41, %v724_v45  ;;  %v76_v48 = vsel %vm72_vm5, %v60_v57, %v75_v42  ;;  %v157_v50 = vshrl.u32 %v582_v29, %v653_v38 }
  0x9f   :  { %v733_v51 = vmul.u32.u64.low %v189_v32, %v188_v25  ;;  %v734_v52 = vmul.u32.u64.high %v189_v32, %v188_v25, %v733_v51  ;;  %v178_v49 = vsel %vm176_vm6, %v166_v16, 2102212464  ;;  %v77_v53 = vsel %vm71_vm7, %v74_v44, %v76_v48 }
  0xa0   :  { %v96_v55 = vadd.s32 1, %v709_v36  ;;  %vm95_vm11 = vc.u32 %v714_v40, %v708_v35  ;;  %v177_v56 = vsel %vm173_vm8, %v157_v50, %v160_v13  ;;  %v179_v29 = vsel %vm175_vm9, %v163_v15, %v178_v49 }
  0xa1   :  { %v93_v38 = vmul.u32 %v86_v19, %v77_v53  ;;  %v180_v58 = vsel %vm174_vm10, %v177_v56, %v179_v29  ;;  %v199_v28 = vadd.s32 1, %v725_v46  ;;  %vm198_vm12 = vc.u32 %v734_v52, %v724_v45 }
  0xa2   :  { %v97_v57 = vsel %vm95_vm11, %v96_v55, %v709_v36  ;;  %v196_v60 = vmul.u32 %v189_v32, %v180_v58  ;;  %v94_v21 = vadd.s32 %v708_v35, %v714_v40  ;;  %vm142_vm2 = vcmp.le.f32.partialorder %v141_v31, 0.7853982 }
  0xa3   :  { %v98_v59 = vadd.s32 %v97_v57, %v93_v38  ;;  %v200_v61 = vsel %vm198_vm12, %v199_v28, %v725_v46  ;;  %vm130_vm11 = vweird.f32 %v638_v11 }
  0xa4   :  { %v201_v63 = vadd.s32 %v200_v61, %v196_v60 }
  0xa5   :  { %v99_v62 = vadd.s32 536870912, %v98_v59 }
  0xa6   :  { %v202_v2 = vadd.s32 536870912, %v201_v63 }
  0xa7   :  { %v100_v1 = vshrl.u32 %v99_v62, 30  ;;  %v465_v62 = vlaneseq }
  0xa8   :  { %v203_v5 = vshrl.u32 %v202_v2, 30 }
  0xa9   :  { %v101_v4 = vshll.u32 %v100_v1, 30  ;;  %v124_v56 = vsub.s32 4, %v100_v1 }
  0xaa   :  { %v204_v7 = vshll.u32 %v203_v5, 30  ;;  %v227_v38 = vsub.s32 4, %v203_v5 }
  0xab   :  { %v102_v6 = vsub.s32 %v98_v59, %v101_v4  ;;  %v125_v29 = vsel %vm40_vm15, %v124_v56, %v100_v1 }
  0xac   :  { %v205_v9 = vsub.s32 %v201_v63, %v204_v7  ;;  %v228_v57 = vsel %vm143_vm1, %v227_v38, %v203_v5 }
  0xad   :  { %v104_v8 = vsub.s32 0, %v102_v6  ;;  %v230_v59 = vsel %vm142_vm2, 0, %v228_v57 }
  0xae   :  { %v207_v10 = vsub.s32 0, %v205_v9  ;;  %v441_v31 = vadd.s32 3, %v230_v59 }
  0xaf   :  { %v512_v54 = vmin.u32 %v104_v8, %v102_v6  ;;  %v466_v8 = vand.u32 127, %v465_v62 }
  0xb0   :  { %v516_v13 = vmin.u32 %v207_v10, %v205_v9  ;;  %v442_v1 = vand.u32 3, %v441_v31 }
  0xb1   :  { %v106_v12 = vclz %v512_v54 }
  0xb2   :  { %v209_v16 = vclz %v516_v13  ;;  %v467_v13 = vand.u32 1, %v466_v8  ;;  %vm444_vm12 = vcmp.eq.s32.totalorder %v442_v1, 0 }
  0xb3   :  { %v513_v15 = vadd.s32 4294967294, %v106_v12 }
  0xb4   :  { %v517_v17 = vadd.s32 4294967294, %v209_v16 }
  0xb5   :  { %vm514_vm13 = vcmp.lt.s32.totalorder %v513_v15, 0 }
  0xb6   :  { %v109_v18 = vsel %vm514_vm13, 0, %v513_v15  ;;  %vm518_vm14 = vcmp.lt.s32.totalorder %v517_v17, 0  ;;  %vm447_vm13 = vcmp.eq.s32.totalorder %v442_v1, 2 }
  0xb7   :  { %v114_v19 = vsub.s32 4294967266, %v109_v18  ;;  %v212_v20 = vsel %vm518_vm14, 0, %v517_v17  ;;  %v110_v22 = vsub.s32 32, %v109_v18  ;;  %v111_v26 = vshll.u32 %v102_v6, %v109_v18 }
  0xb8   :  { %v217_v24 = vsub.s32 4294967266, %v212_v20  ;;  %v213_v34 = vsub.s32 32, %v212_v20  ;;  %v214_v41 = vshll.u32 %v205_v9, %v212_v20  ;;  %v234_v9 = vand.u32 3, %v230_v59 }
  0xb9   :  { %v115_v23 = vadd.s32 127, %v114_v19  ;;  %v112_v30 = vshrl.u32 %v94_v21, %v110_v22 }
  0xba   :  { %v218_v36 = vadd.s32 127, %v217_v24  ;;  %vm236_vm8 = vcmp.eq.s32.totalorder %v234_v9, 0  ;;  %vm239_vm9 = vcmp.eq.s32.totalorder %v234_v9, 2  ;;  %vm235_vm14 = vcmp.lt.s32.totalorder %v234_v9, 2 }
  0xbb   :  { %v116_v32 = vshll.u32 %v115_v23, 23 }
  0xbc   :  { %v219_v25 = vshll.u32 %v218_v36, 23 }
  0xbd   :  { %v117_v39 = vor.u32 4788187, %v116_v32 }
  0xe8   :  { %v460_v33 = vpop.permute.xlu0 %459 }
  0xe9   :  { %v463_v37 = vsel %vm452_vm0, %v460_v33, %v616_v0  ;;  %v197_v33 = vadd.s32 %v724_v45, %v734_v52 }
  0xea   :  { %471 = vrot.lane.b32.xlu0 %v463_v37, %s588_s0 }
  0xeb   :  { %v215_v42 = vshrl.u32 %v197_v33, %v213_v34 }
  0xec   :  { %v462_v43 = vpop.permute.xlu1 %461 }
  0xed   :  { %v464_v47 = vsel %vm452_vm0, %v462_v43, %v625_v3  ;;  %v118_v43 = vand.u32 2147483647, %v117_v39  ;;  %v216_v46 = vor.u32 %v215_v42, %v214_v41  ;;  %vm39_vm0 = vcmp.le.f32.partialorder %v38_v27, 0.7853982 }
  0xee   :  { %473 = vrot.lane.b32.xlu1 %v464_v47, %s588_s0  ;;  %477 = vrot.lane.b32.xlu0 %v463_v37, %s589_s1  ;;  %v113_v37 = vor.u32 %v112_v30, %v111_v26  ;;  %v127_v27 = vsel %vm39_vm0, 0, %v125_v29 }
  0xef   :  { %v223_v48 = vcvt.s32.f32 %v216_v46  ;;  %v337_v58 = vadd.s32 3, %v127_v27  ;;  %v131_v61 = vand.u32 3, %v127_v27 }
  0xf0   :  { %v120_v44 = vcvt.s32.f32 %v113_v37 }
  0xf1   :  { %v338_v63 = vand.u32 3, %v337_v58  ;;  %vm133_vm3 = vcmp.eq.s32.totalorder %v131_v61, 0  ;;  %vm136_vm4 = vcmp.eq.s32.totalorder %v131_v61, 2  ;;  %vm132_vm5 = vcmp.lt.s32.totalorder %v131_v61, 2 }
  0xf2   :  { %479 = vrot.lane.b32.xlu1 %v464_v47, %s589_s1  ;;  %v220_v47 = vor.u32 4788187, %v219_v25  ;;  %v121_v35 = vmul.f32 %v120_v44, %v118_v43 }
  0xf3   :  { %vm340_vm6 = vcmp.eq.s32.totalorder %v338_v63, 0  ;;  %vm343_vm7 = vcmp.eq.s32.totalorder %v338_v63, 2  ;;  %vm339_vm10 = vcmp.lt.s32.totalorder %v338_v63, 2 }
  0xf4   :  { %v221_v40 = vand.u32 2147483647, %v220_v47  ;;  %v122_v50 = vxor.u32 2147483648, %v121_v35 }
  0xf6   :  { %v224_v51 = vmul.f32 %v223_v48, %v221_v40  ;;  %v123_v45 = vsel %vm40_vm15, %v122_v50, %v121_v35  ;;  %vm764_vm15 = vcmp.eq.s32.totalorder %v467_v13, 0 }
  0xf7   :  { %v126_v49 = vsel %vm39_vm0, %v638_v11, %v123_v45  ;;  %vm443_vm0 = vcmp.lt.s32.totalorder %v442_v1, 2 }
  0xf8   :  { %v225_v52 = vxor.u32 2147483648, %v224_v51  ;;  %550 = vcosq.f32 %v126_v49 }
  0xf9   :  { %552 = vsinq.f32 %v126_v49 }
  0xfa   :  { %v226_v53 = vsel %vm143_vm1, %v225_v52, %v224_v51  ;;  %vm233_vm1 = vweird.f32 %v641_v14 }
  0xfb   :  { %v229_v55 = vsel %vm142_vm2, %v641_v14, %v226_v53  ;;  %vm491_vm2 = vcmask 261120  }
  0xfc   :  { %554 = vcosq.f32 %v229_v55 }
  0xfd   :  { %556 = vsinq.f32 %v229_v55 }
 0x105   :  { %v551_v28 = vpop.eup %550 }
 0x106   :  { %v553_v60 = vpop.eup %552  ;;  %v137_v6 = vxor.u32 2147483648, %v551_v28 }
 0x107   :  { %v134_v4 = vxor.u32 2147483648, %v553_v60 }
 0x108   :  { %v138_v54 = vsel %vm136_vm4, %v137_v6, %v553_v60  ;;  %v345_v16 = vsel %vm343_vm7, %v137_v6, %v553_v60 }
 0x109   :  { %v555_v2 = vpop.eup %554  ;;  %v135_v5 = vsel %vm133_vm3, %v551_v28, %v134_v4  ;;  %v342_v15 = vsel %vm340_vm6, %v551_v28, %v134_v4 }
 0x10a   :  { %v557_v7 = vpop.eup %556  ;;  %v240_v12 = vxor.u32 2147483648, %v555_v2  ;;  %v139_v18 = vsel %vm132_vm5, %v135_v5, %v138_v54  ;;  %v346_v21 = vsel %vm339_vm10, %v342_v15, %v345_v16 }
 0x10b   :  { %v237_v10 = vxor.u32 2147483648, %v557_v7  ;;  %v140_v23 = vsel %vm130_vm11, nan, %v139_v18  ;;  %v347_v34 = vsel %vm130_vm11, nan, %v346_v21 }
 0x10c   :  { %v241_v20 = vsel %vm239_vm9, %v240_v12, %v557_v7  ;;  %v449_v26 = vsel %vm447_vm13, %v240_v12, %v557_v7  ;;  %v485_v37 = vmul.f32 %v140_v23, %v616_v0 }
 0x10d   :  { %v238_v19 = vsel %vm236_vm8, %v555_v2, %v237_v10  ;;  %v446_v24 = vsel %vm444_vm12, %v555_v2, %v237_v10 }
 0x10e   :  { %v242_v33 = vsel %vm235_vm14, %v238_v19, %v241_v20  ;;  %v450_v41 = vsel %vm443_vm0, %v446_v24, %v449_v26 }
 0x10f   :  { %v243_v42 = vsel %vm233_vm1, nan, %v242_v33  ;;  %v451_v44 = vsel %vm233_vm1, nan, %v450_v41 }
 0x110   :  { %v486_v11 = vmul.f32 %v243_v42, %v625_v3 }
 0x15c   :  { %v472_v17 = vpop.permute.xlu0 %471 }
 0x160   :  { %v474_v30 = vpop.permute.xlu1 %473  ;;  %v478_v32 = vpop.permute.xlu0 %477 }
 0x161   :  { %v483_v36 = vsel %vm764_vm15, %v472_v17, %v478_v32 }
 0x162   :  { %v487_v39 = vmul.f32 %v483_v36, %v347_v34 }
 0x164   :  { %v489_v25 = vadd.f32 %v487_v39, %v485_v37  ;;  %v480_v43 = vpop.permute.xlu1 %479 }
 0x165   :  { %v484_v14 = vsel %vm764_vm15, %v474_v30, %v480_v43 }
 0x166   :  { %492 = vst.msk [vmem:[#allocation2] sm:$0xff] %vm491_vm2, %v489_v25  ;;  %v488_v46 = vmul.f32 %v484_v14, %v451_v44 }
 0x168   :  { %v490_v47 = vadd.f32 %v488_v46, %v486_v11 }
 0x16a   :  { %493 = vst.msk [vmem:[#allocation2 + $0x8] sm:$0xff] %vm491_vm2, %v490_v47 }
 0x16b   :  { %569 = shalt.err (!%p566_p4)
}
 0x16c   :  { %s591_s25 = smov 128   ;;  %s592_s26 = smov 8  }
 0x16d   :  { %505 = dma.vmem_to_hbm [thread:$0]  %s500_s23, 256, %s785_s3, [#allocation3], %s591_s25, %s591_s25, %s592_s26  }
 0x16e   :  { %578 = dma.done.wait [#allocation3], 256  }
 0x16f   :  { %579 = vsyncadd [#allocation3], 4294967040 }
 0x170   :  { %509 = vsyncpa [#allocation3], 1 }

</bundles_post_ra>
